<compile_context>
chip_gen: v5e
topology: v5e:2x2
jax: 0.10.0
libtpu: 0.0.40
codegen_flags: <defaults>
</compile_context>

<pallas_src>
import functools

import jax
import jax.numpy as jnp
from jax.experimental import pallas as pl
from jax.experimental.pallas import tpu as pltpu

A_CONST = 0.05809935762708783
B_CONST = 4.309885529518155
C_CONST = 0.05747969878947174

H1 = 512
H2 = 64


def _round_up(x, m):
    return ((x + m - 1) // m) * m


def _density_kernel(x_ref, w1_ref, t1_ref, w2_ref, b2_ref, w3_ref, c3_ref, o_ref,
                    *, compute_dtype):
    # ---- layer 1: Linear(E,512, no bias) with BN1 scale pre-folded into the weights ----
    x = x_ref[...].astype(compute_dtype)
    h1 = jnp.dot(x, w1_ref[...], preferred_element_type=jnp.float32)
    h1 = jnp.maximum(h1 + t1_ref[...], 0.0)            # folded BN1 shift + ReLU
    # Dropout: identity (eval mode).

    # ---- layer 2: Linear(512,64) with BN2 scale folded into weights, bias folded ----
    h2 = jnp.dot(h1.astype(compute_dtype), w2_ref[...],
                 preferred_element_type=jnp.float32)
    h2 = jnp.maximum(h2 + b2_ref[...], 0.0)             # folded (bias*s2 + t2) + ReLU
    # Dropout: identity (eval mode).

    # ---- layer 3 (64 -> 1) as VPU multiply + lane reduce; B_CONST pre-folded into w3 ----
    y = jnp.sum(h2 * w3_ref[...], axis=-1)              # (tile_n,)

    # ---- density inductive bias, folded: 1/(a*exp(-b*(y-c))) == exp(B*y_raw + shift) ----
    dens = jnp.exp(y + c3_ref[0])

    # Lane-dense store: block is (tile_n//128, 128) (or (1, tile_n) for a single tile).
    o_ref[...] = dens.reshape(o_ref.shape).astype(o_ref.dtype)


@functools.partial(jax.jit, static_argnames=("tile_n", "compute_dtype"))
def density_block_forward(x, params, *, tile_n=1024, compute_dtype=jnp.bfloat16):
    """x: (N, emb_dims) float32. params: folded parameters from make_params()."""
    n, e = x.shape

    # --- choose tile size / output layout that satisfy the (8, 128) block rules ---
    n_r8 = _round_up(n, 8)
    if n_r8 <= tile_n:
        tile_n = n_r8                       # single tile: block == full array dims
    else:
        tile_n = _round_up(tile_n, 1024)    # multi-tile: keep (tile_n//128,128) blocks legal
    n_pad = _round_up(n, tile_n)
    num_tiles = n_pad // tile_n

    if n_pad != n:
        x = jnp.pad(x, ((0, n_pad - n), (0, 0)))

    if num_tiles == 1:
        out_shape2d = (1, tile_n)
        out_block = (1, tile_n)             # equals full dims
    else:
        out_shape2d = (n_pad // 128, 128)
        out_block = (tile_n // 128, 128)    # (>=8, 128): fully aligned, lane-dense

    # Cast matmul operands (weights) to the compute dtype outside the kernel.
    w1c = params["w1_fold"].astype(compute_dtype)
    w2c = params["w2_fold"].astype(compute_dtype)

    const_map = lambda i: (0, 0)            # weights stay resident across the grid
    in_specs = [
        pl.BlockSpec((tile_n, e), lambda i: (i, 0)),    # x tile
        pl.BlockSpec((e, H1), const_map),               # folded W1
        pl.BlockSpec((1, H1), const_map),               # BN1 shift
        pl.BlockSpec((H1, H2), const_map),              # folded W2
        pl.BlockSpec((1, H2), const_map),               # folded bias2
        pl.BlockSpec((1, H2), const_map),               # B_CONST * w3 row
        pl.BlockSpec(memory_space=pltpu.SMEM),          # output-shift scalar
    ]
    out_specs = pl.BlockSpec(out_block, lambda i: (i, 0))

    flops = 2 * n_pad * (e * H1 + H1 * H2 + H2)
    bytes_accessed = (n_pad * (e * x.dtype.itemsize + 4)
                      + w1c.size * w1c.dtype.itemsize
                      + w2c.size * w2c.dtype.itemsize
                      + 4 * (H1 + 2 * H2 + 1))

    out2d = pl.pallas_call(
        functools.partial(_density_kernel, compute_dtype=compute_dtype),
        out_shape=jax.ShapeDtypeStruct(out_shape2d, jnp.float32),
        grid=(num_tiles,),
        in_specs=in_specs,
        out_specs=out_specs,
        compiler_params=pltpu.CompilerParams(
            dimension_semantics=("parallel",),
            vmem_limit_bytes=32 * 1024 * 1024,
        ),
        cost_estimate=pl.CostEstimate(
            flops=int(flops),
            transcendentals=int(n_pad),
            bytes_accessed=int(bytes_accessed),
        ),
    )(
        x, w1c, params["bn1_shift"], w2c, params["b2_fold"],
        params["w3_fold"], params["out_shift"],
    )

    # Layout plumbing back to the module's (N, 1) output.
    return out2d.reshape(n_pad, 1)[:n]


def make_params(key, emb_dims):
    """Deterministic synthetic parameters matching DensityBlock.__init__ shapes.

    Returns (folded_params_for_kernel, raw_params_for_reference).
    """
    ks = jax.random.split(key, 12)
    eps = 1e-5  # nn.BatchNorm1d default

    # linear1: (512, emb_dims), no bias
    w1 = jax.random.normal(ks[0], (H1, emb_dims), jnp.float32) * 0.05
    g1 = 1.0 + 0.1 * jax.random.normal(ks[1], (H1,), jnp.float32)
    be1 = 0.1 * jax.random.normal(ks[2], (H1,), jnp.float32)
    rm1 = 0.1 * jax.random.normal(ks[3], (H1,), jnp.float32)
    rv1 = jnp.abs(jax.random.normal(ks[4], (H1,), jnp.float32)) + 0.5

    # linear2: (64, 512) + bias(64)
    w2 = jax.random.normal(ks[5], (H2, H1), jnp.float32) * 0.05
    b2 = 0.05 * jax.random.normal(ks[6], (H2,), jnp.float32)
    g2 = 1.0 + 0.1 * jax.random.normal(ks[7], (H2,), jnp.float32)
    be2 = 0.1 * jax.random.normal(ks[8], (H2,), jnp.float32)
    rm2 = 0.1 * jax.random.normal(ks[9], (H2,), jnp.float32)
    rv2 = jnp.abs(jax.random.normal(ks[10], (H2,), jnp.float32)) + 0.5

    # linear3: (1, 64) + bias(1)
    w3 = jax.random.normal(ks[11], (1, H2), jnp.float32) * 0.05
    b3 = jnp.array([0.01], jnp.float32)

    raw = dict(w1=w1, g1=g1, be1=be1, rm1=rm1, rv1=rv1,
               w2=w2, b2=b2, g2=g2, be2=be2, rm2=rm2, rv2=rv2,
               w3=w3, b3=b3)

    # Fold BN (inference running stats):  bn(z) = z*scale + shift
    s1 = g1 / jnp.sqrt(rv1 + eps)
    t1 = be1 - rm1 * s1
    s2 = g2 / jnp.sqrt(rv2 + eps)
    t2 = be2 - rm2 * s2

    folded = {
        "w1_fold": w1.T * s1[None, :],                  # (E, 512) with BN1 scale
        "bn1_shift": t1.reshape(1, H1),
        "w2_fold": w2.T * s2[None, :],                  # (512, 64) with BN2 scale
        "b2_fold": (b2 * s2 + t2).reshape(1, H2),
        "w3_fold": (B_CONST * w3).reshape(1, H2),       # B folded into output row
        # 1/(a*exp(-b*(y-c))) with y = h2@w3 + b3  ==  exp(B*(h2@w3) + out_shift)
        "out_shift": (B_CONST * (b3 - C_CONST) - jnp.log(A_CONST)).astype(jnp.float32),
    }
    return folded, raw


def reference_forward(x, raw):
    """Plain-JAX reference matching the PyTorch module (eval mode) exactly."""
    eps = 1e-5
    h1 = x @ raw["w1"].T
    h1 = (h1 - raw["rm1"]) / jnp.sqrt(raw["rv1"] + eps) * raw["g1"] + raw["be1"]
    h1 = jnp.maximum(h1, 0.0)
    h2 = h1 @ raw["w2"].T + raw["b2"]
    h2 = (h2 - raw["rm2"]) / jnp.sqrt(raw["rv2"] + eps) * raw["g2"] + raw["be2"]
    h2 = jnp.maximum(h2, 0.0)
    y = h2 @ raw["w3"].T + raw["b3"]
    return 1.0 / (A_CONST * jnp.exp(-B_CONST * (y - C_CONST)))


if __name__ == "__main__":
    key = jax.random.PRNGKey(0)
    k_x, k_p, k_x2 = jax.random.split(key, 3)

    emb_dims = 32
    params, raw = make_params(k_p, emb_dims)

    # --- small single-tile case ---
    batch = 8
    x = jax.random.normal(k_x, (batch, emb_dims), jnp.float32)

    out = jax.block_until_ready(density_block_forward(x, params))          # bf16 matmuls
    ref = reference_forward(x, raw)
    assert out.shape == (batch, 1), out.shape
    assert jnp.allclose(out, ref, rtol=5e-2, atol=1e-2), (out, ref)

    # f32 compute path must match the PyTorch-semantics reference tightly.
    out32 = jax.block_until_ready(
        density_block_forward(x, params, compute_dtype=jnp.float32))
    assert jnp.allclose(out32, ref, rtol=1e-4, atol=1e-5), (out32, ref)

    # --- multi-tile + padded path (exercises the batch grid) ---
    batch2 = 2500                                  # -> 3 tiles of 1024 rows (572 padded)
    x2 = jax.random.normal(k_x2, (batch2, emb_dims), jnp.float32)
    out2 = jax.block_until_ready(density_block_forward(x2, params))
    ref2 = reference_forward(x2, raw)
    assert out2.shape == (batch2, 1), out2.shape
    assert jnp.allclose(out2, ref2, rtol=5e-2, atol=1e-2)

    print("KERNEL_OK")
</pallas_src>

<mosaic_0001>
module attributes {stable_mosaic.version = 11 : i64} {
  func.func @_density_kernel(%arg0: i32, %arg1: memref<8x32xf32, #tpu.memory_space<vmem>>, %arg2: memref<32x512xbf16, #tpu.memory_space<vmem>>, %arg3: memref<1x512xf32, #tpu.memory_space<vmem>>, %arg4: memref<512x64xbf16, #tpu.memory_space<vmem>>, %arg5: memref<1x64xf32, #tpu.memory_space<vmem>>, %arg6: memref<1x64xf32, #tpu.memory_space<vmem>>, %arg7: memref<1xf32, #tpu.memory_space<smem>>, %arg8: memref<1x8xf32, #tpu.memory_space<vmem>>) attributes {dimension_semantics = [#tpu.dimension_semantics<parallel>], iteration_bounds = array<i64: 1>, scalar_prefetch = 0 : i64, scratch_operands = 0 : i64, tpu.core_type = #tpu.core_type<tc>, window_params = [{transform_indices = @transform_0, window_bounds = array<i64: 8, 32>}, {pipeline_mode = #tpu.pipeline_mode<synchronous>, transform_indices = @transform_1, window_bounds = array<i64: 32, 512>}, {pipeline_mode = #tpu.pipeline_mode<synchronous>, transform_indices = @transform_2, window_bounds = array<i64: 1, 512>}, {pipeline_mode = #tpu.pipeline_mode<synchronous>, transform_indices = @transform_3, window_bounds = array<i64: 512, 64>}, {pipeline_mode = #tpu.pipeline_mode<synchronous>, transform_indices = @transform_4, window_bounds = array<i64: 1, 64>}, {pipeline_mode = #tpu.pipeline_mode<synchronous>, transform_indices = @transform_5, window_bounds = array<i64: 1, 64>}, {transform_indices = @transform_6, window_bounds = array<i64: 1>}, {transform_indices = @transform_7, window_bounds = array<i64: 1, 8>}]} {
    %c0 = arith.constant 0 : index
    %c0_0 = arith.constant 0 : index
    %0 = vector.load %arg1[%c0, %c0_0] : memref<8x32xf32, #tpu.memory_space<vmem>>, vector<8x32xf32>
    %1 = arith.truncf %0 : vector<8x32xf32> to vector<8x32xbf16>
    %c0_1 = arith.constant 0 : index
    %c0_2 = arith.constant 0 : index
    %2 = vector.load %arg2[%c0_1, %c0_2] : memref<32x512xbf16, #tpu.memory_space<vmem>>, vector<32x512xbf16>
    %cst = arith.constant dense<0.000000e+00> : vector<8x512xf32>
    %3 = tpu.matmul %1, %2, %cst {dimension_numbers = #tpu.dot_dimension_numbers<[1], [0], [0], [1], [0, 0, 1, 1], [], []>} : vector<8x32xbf16>, vector<32x512xbf16>, vector<8x512xf32> -> vector<8x512xf32>
    %c0_3 = arith.constant 0 : index
    %c0_4 = arith.constant 0 : index
    %4 = vector.load %arg3[%c0_3, %c0_4] : memref<1x512xf32, #tpu.memory_space<vmem>>, vector<1x512xf32>
    %5 = vector.broadcast %4 : vector<1x512xf32> to vector<8x512xf32>
    %6 = arith.addf %3, %5 : vector<8x512xf32>
    %cst_5 = arith.constant 0.000000e+00 : f32
    %7 = vector.broadcast %cst_5 : f32 to vector<8x512xf32>
    %8 = arith.maximumf %6, %7 : vector<8x512xf32>
    %9 = arith.truncf %8 : vector<8x512xf32> to vector<8x512xbf16>
    %c0_6 = arith.constant 0 : index
    %c0_7 = arith.constant 0 : index
    %10 = vector.load %arg4[%c0_6, %c0_7] : memref<512x64xbf16, #tpu.memory_space<vmem>>, vector<512x64xbf16>
    %cst_8 = arith.constant dense<0.000000e+00> : vector<8x64xf32>
    %11 = tpu.matmul %9, %10, %cst_8 {dimension_numbers = #tpu.dot_dimension_numbers<[1], [0], [0], [1], [0, 0, 1, 1], [], []>} : vector<8x512xbf16>, vector<512x64xbf16>, vector<8x64xf32> -> vector<8x64xf32>
    %c0_9 = arith.constant 0 : index
    %c0_10 = arith.constant 0 : index
    %12 = vector.load %arg5[%c0_9, %c0_10] : memref<1x64xf32, #tpu.memory_space<vmem>>, vector<1x64xf32>
    %13 = vector.broadcast %12 : vector<1x64xf32> to vector<8x64xf32>
    %14 = arith.addf %11, %13 : vector<8x64xf32>
    %cst_11 = arith.constant 0.000000e+00 : f32
    %15 = vector.broadcast %cst_11 : f32 to vector<8x64xf32>
    %16 = arith.maximumf %14, %15 : vector<8x64xf32>
    %c0_12 = arith.constant 0 : index
    %c0_13 = arith.constant 0 : index
    %17 = vector.load %arg6[%c0_12, %c0_13] : memref<1x64xf32, #tpu.memory_space<vmem>>, vector<1x64xf32>
    %18 = vector.broadcast %17 : vector<1x64xf32> to vector<8x64xf32>
    %19 = arith.mulf %16, %18 : vector<8x64xf32>
    %cst_14 = arith.constant dense<0.000000e+00> : vector<8xf32>
    %20 = vector.multi_reduction <add>, %19, %cst_14 [1] : vector<8x64xf32> to vector<8xf32>
    %c0_15 = arith.constant 0 : index
    %21 = memref.load %arg7[%c0_15] : memref<1xf32, #tpu.memory_space<smem>>
    %22 = vector.broadcast %21 : f32 to vector<8xf32>
    %23 = arith.addf %20, %22 : vector<8xf32>
    %24 = math.exp %23 : vector<8xf32>
    %25 = vector.shape_cast %24 : vector<8xf32> to vector<1x8xf32>
    %c0_16 = arith.constant 0 : index
    %c0_17 = arith.constant 0 : index
    %26 = vector.load %arg8[%c0_16, %c0_17] : memref<1x8xf32, #tpu.memory_space<vmem>>, vector<1x8xf32>
    tpu.vector_store %arg8[%c0_16, %c0_17], %25 {strides = array<i32>} : memref<1x8xf32, #tpu.memory_space<vmem>>, vector<1x8xf32>,
    return
  }
  func.func @transform_0(%arg0: i32) -> (i32, i32) {
    %c0_i32 = arith.constant 0 : i32
    %c0_i32_0 = arith.constant 0 : i32
    return %arg0, %c0_i32 : i32, i32
  }
  func.func @transform_1(%arg0: i32) -> (i32, i32) {
    %c0_i32 = arith.constant 0 : i32
    %c0_i32_0 = arith.constant 0 : i32
    %c0_i32_1 = arith.constant 0 : i32
    return %c0_i32, %c0_i32_0 : i32, i32
  }
  func.func @transform_2(%arg0: i32) -> (i32, i32) {
    %c0_i32 = arith.constant 0 : i32
    %c0_i32_0 = arith.constant 0 : i32
    %c0_i32_1 = arith.constant 0 : i32
    return %c0_i32, %c0_i32_0 : i32, i32
  }
  func.func @transform_3(%arg0: i32) -> (i32, i32) {
    %c0_i32 = arith.constant 0 : i32
    %c0_i32_0 = arith.constant 0 : i32
    %c0_i32_1 = arith.constant 0 : i32
    return %c0_i32, %c0_i32_0 : i32, i32
  }
  func.func @transform_4(%arg0: i32) -> (i32, i32) {
    %c0_i32 = arith.constant 0 : i32
    %c0_i32_0 = arith.constant 0 : i32
    %c0_i32_1 = arith.constant 0 : i32
    return %c0_i32, %c0_i32_0 : i32, i32
  }
  func.func @transform_5(%arg0: i32) -> (i32, i32) {
    %c0_i32 = arith.constant 0 : i32
    %c0_i32_0 = arith.constant 0 : i32
    %c0_i32_1 = arith.constant 0 : i32
    return %c0_i32, %c0_i32_0 : i32, i32
  }
  func.func @transform_6(%arg0: i32) -> i32 {
    %c0_i32 = arith.constant 0 : i32
    %c0_i32_0 = arith.constant 0 : i32
    return %c0_i32 : i32
  }
  func.func @transform_7(%arg0: i32) -> (i32, i32) {
    %c0_i32 = arith.constant 0 : i32
    %c0_i32_0 = arith.constant 0 : i32
    return %arg0, %c0_i32 : i32, i32
  }
}

</mosaic_0001>

<bundles_post_ra>
// kernel: density_block_forward.1
= control target key start
LH: loop header
LB: loop body
LE: loop exit
PB: predicated region body
PF: predicated region fallthrough
CT: control target
= control target key end

     0   :  { %vm89_vm0 = vcmask 261120   ;;  %s941_s0 = inlined_call_operand.vmem [shape: f32[8,32], index: 0, kind: input, shape index: {}]   ;;  %s942_s1 = inlined_call_operand.vmem [shape: bf16[32,512], index: 1, kind: input, shape index: {}]   ;;  %s943_s2 = inlined_call_operand.vmem [shape: f32[1,512], index: 2, kind: input, shape index: {}]   ;;  %s944_s3 = inlined_call_operand.vmem [shape: bf16[512,64], index: 3, kind: input, shape index: {}]   ;;  %s945_s4 = inlined_call_operand.vmem [shape: f32[1,64], index: 4, kind: input, shape index: {}]   ;;  %s946_s5 = inlined_call_operand.vmem [shape: f32[1,64], index: 5, kind: input, shape index: {}]   ;;  %s947_s6 = inlined_call_operand.<no memory space> [shape: f32[1], index: 6, kind: input, shape index: {}]   ;;  %s948_s7 = inlined_call_operand.hbm [shape: f32[1,8], index: 7, kind: output, shape index: {}]  }
   0x1   :  { %v521_v0 = vld [vmem:[%s942_s1 + $0x20] sm:$0xf]  ;;  %v673_v1 = vld [vmem:[%s942_s1 + $0x2c] sm:$0xf0]  ;;  %v529_v2 = vld [vmem:[%s942_s1 + $0x28] sm:$0xf] }
   0x2   :  { %v522_v3 = vor.u32 %v673_v1, %v521_v0  ;;  %v674_v4 = vld [vmem:[%s942_s1 + $0x34] sm:$0xf0]  ;;  %v672_v5 = vld [vmem:[%s942_s1 + $0x2c] sm:$0xf]  ;;  %v531_v6 = vld [vmem:[%s942_s1 + $0x38] sm:$0xf0] }
   0x3   :  { %v530_v7 = vor.u32 %v674_v4, %v529_v2  ;;  %v534_v8 = vor.u32 %v672_v5, %v531_v6  ;;  %v671_v9 = vld [vmem:[%s942_s1 + $0x24] sm:$0xf]  ;;  %v523_v10 = vld [vmem:[%s942_s1 + $0x30] sm:$0xf0]  ;;  %v505_v11 = vld [vmem:[%s942_s1] sm:$0xf] }
   0x4   :  { %99 = vmatpush.bf16.msra.mxu0 %v522_v3  ;;  %v526_v12 = vor.u32 %v671_v9, %v523_v10  ;;  %v669_v13 = vld [vmem:[%s942_s1 + $0xc] sm:$0xf0]  ;;  %v513_v14 = vld [vmem:[%s942_s1 + $0x8] sm:$0xf]  ;;  %v670_v15 = vld [vmem:[%s942_s1 + $0x14] sm:$0xf0] }
   0x5   :  { %125 = vmatpush.bf16.msra.mxu2 %v530_v7  ;;  %138 = vmatpush.bf16.msra.mxu3 %v534_v8  ;;  %v506_v16 = vor.u32 %v669_v13, %v505_v11  ;;  %v514_v17 = vor.u32 %v670_v15, %v513_v14  ;;  %v668_v18 = vld [vmem:[%s942_s1 + $0xc] sm:$0xf]  ;;  %v515_v19 = vld [vmem:[%s942_s1 + $0x18] sm:$0xf0]  ;;  %v667_v20 = vld [vmem:[%s942_s1 + $0x4] sm:$0xf] }
   0x6   :  { %112 = vmatpush.bf16.msra.mxu1 %v526_v12  ;;  %v518_v21 = vor.u32 %v668_v18, %v515_v19  ;;  %v507_v22 = vld [vmem:[%s942_s1 + $0x10] sm:$0xf0]  ;;  %v29_v23 = vld [vmem:[%s941_s0] sm:$0xff]  ;;  %v682_v24 = vld [vmem:[%s944_s3 + $0x38] sm:$0xff] }
   0x7   :  { %v510_v25 = vor.u32 %v667_v20, %v507_v22  ;;  %v30_v26 = vpack.c.bf16 %v29_v23, %v29_v23  ;;  %v690_v27 = vld [vmem:[%s944_s3 + $0x78] sm:$0xff]  ;;  %v681_v29 = vld [vmem:[%s944_s3 + $0x30] sm:$0xff]  ;;  %v680_v32 = vld [vmem:[%s944_s3 + $0x28] sm:$0xff] }
   0x8   :  { %100 = vmatpush.bf16.msra.mxu0 %v506_v16  ;;  %v698_v28 = vld [vmem:[%s944_s3 + $0xb8] sm:$0xff]  ;;  %v689_v31 = vld [vmem:[%s944_s3 + $0x70] sm:$0xff]  ;;  %v688_v35 = vld [vmem:[%s944_s3 + $0x68] sm:$0xff] }
   0x9   :  { %126 = vmatpush.bf16.msra.mxu2 %v514_v17  ;;  %139 = vmatpush.bf16.msra.mxu3 %v518_v21  ;;  %v706_v30 = vld [vmem:[%s944_s3 + $0xf8] sm:$0xff]  ;;  %v697_v33 = vld [vmem:[%s944_s3 + $0xb0] sm:$0xff] }
   0xa   :  { %113 = vmatpush.bf16.msra.mxu1 %v510_v25  ;;  %v705_v34 = vld [vmem:[%s944_s3 + $0xf0] sm:$0xff] }
   0xb   :  { %535 = vmatmul.msk.bf16.vlgmr.msra.gmra.mxu0 %vm89_vm0, %v30_v26 }
   0xc   :  { %413 = vmatpush.bf16.msrb.mxu0 %v682_v24  ;;  %537 = vmatmul.msk.bf16.vlgmr.msra.gmra.mxu2 %vm89_vm0, %v30_v26 }
   0xd   :  { %538 = vmatmul.msk.bf16.vlgmr.msra.gmra.mxu3 %vm89_vm0, %v30_v26  ;;  %536 = vmatmul.msk.bf16.vlgmr.msra.gmra.mxu1 %vm89_vm0, %v30_v26 }
   0xe   :  { %426 = vmatpush.bf16.msrb.mxu1 %v690_v27  ;;  %439 = vmatpush.bf16.msrb.mxu2 %v698_v28 }
   0xf   :  { %452 = vmatpush.bf16.msrb.mxu3 %v706_v30 }
  0x10   :  { %414 = vmatpush.bf16.msrb.mxu0 %v681_v29 }
  0x12   :  { %427 = vmatpush.bf16.msrb.mxu1 %v689_v31 }
  0x13   :  { %13 = vsyncpa [#allocation4], 0  ;;  %440 = vmatpush.bf16.msrb.mxu2 %v697_v33  ;;  %v696_v36 = vld [vmem:[%s944_s3 + $0xa8] sm:$0xff]  ;;  %453 = vmatpush.bf16.msrb.mxu3 %v705_v34  ;;  %v679_v37 = vld [vmem:[%s944_s3 + $0x20] sm:$0xff]  ;;  %vm471_vm1 = vcmask 523264   ;;  %s738_s29 = smov [#allocation3]  }
  0x14   :  { %415 = vmatpush.bf16.msrb.mxu0 %v680_v32  ;;  %v704_v38 = vld [vmem:[%s944_s3 + $0xe8] sm:$0xff]  ;;  %v687_v39 = vld [vmem:[%s944_s3 + $0x60] sm:$0xff]  ;;  %v678_v41 = vld [vmem:[%s944_s3 + $0x18] sm:$0xff]  ;;  %s492_s30 = sshll.u32 %s738_s29, 4  ;;  %s494_s9 = sshll.u32 %s948_s7, 4  ;;  %vm485_vm2 = vcmask 57344   ;;  %s493_s30 = int_to_ptr.vmem [resolvable:$true] %s492_s30  ;;  %s495_s9 = int_to_ptr.hbm [resolvable:$true] %s494_s9 }
  0x15   :  { %v695_v40 = vld [vmem:[%s944_s3 + $0xa0] sm:$0xff]  ;;  %v686_v43 = vld [vmem:[%s944_s3 + $0x58] sm:$0xff]  ;;  %v677_v45 = vld [vmem:[%s944_s3 + $0x10] sm:$0xff] }
  0x16   :  { %428 = vmatpush.bf16.msrb.mxu1 %v688_v35  ;;  %v703_v42 = vld [vmem:[%s944_s3 + $0xe0] sm:$0xff]  ;;  %v694_v44 = vld [vmem:[%s944_s3 + $0x98] sm:$0xff]  ;;  %v685_v47 = vld [vmem:[%s944_s3 + $0x50] sm:$0xff] }
  0x17   :  { %441 = vmatpush.bf16.msrb.mxu2 %v696_v36  ;;  %454 = vmatpush.bf16.msrb.mxu3 %v704_v38  ;;  %v702_v46 = vld [vmem:[%s944_s3 + $0xd8] sm:$0xff]  ;;  %v676_v48 = vld [vmem:[%s944_s3 + $0x8] sm:$0xff]  ;;  %v693_v50 = vld [vmem:[%s944_s3 + $0x90] sm:$0xff]  ;;  %v476_v36 = vstv %s947_s6 }
  0x18   :  { %416 = vmatpush.bf16.msrb.mxu0 %v679_v37  ;;  %v684_v49 = vld [vmem:[%s944_s3 + $0x48] sm:$0xff]  ;;  %v701_v51 = vld [vmem:[%s944_s3 + $0xd0] sm:$0xff]  ;;  %v675_v52 = vld [vmem:[%s944_s3] sm:$0xff] }
  0x19   :  { %v683_v53 = vld [vmem:[%s944_s3 + $0x40] sm:$0xff]  ;;  %v692_v54 = vld [vmem:[%s944_s3 + $0x88] sm:$0xff] }
  0x1a   :  { %429 = vmatpush.bf16.msrb.mxu1 %v687_v39  ;;  %v700_v55 = vld [vmem:[%s944_s3 + $0xc8] sm:$0xff]  ;;  %v691_v56 = vld [vmem:[%s944_s3 + $0x80] sm:$0xff] }
  0x1b   :  { %442 = vmatpush.bf16.msrb.mxu2 %v695_v40  ;;  %455 = vmatpush.bf16.msrb.mxu3 %v703_v42  ;;  %v699_v57 = vld [vmem:[%s944_s3 + $0xc0] sm:$0xff]  ;;  %v481_v40 = vlaneseq }
  0x1c   :  { %417 = vmatpush.bf16.msrb.mxu0 %v678_v41  ;;  %v39_v58 = vld [vmem:[%s943_s2] sm:$0xf] }
  0x1d   :  { %v41_v59 = vperm.slane %v39_v58, 0  ;;  %v42_v60 = vperm.slane %v39_v58, 1  ;;  %v43_v2 = vperm.slane %v39_v58, 2  ;;  %v44_v3 = vperm.slane %v39_v58, 3  ;;  %v708_v20 = vld [vmem:[%s945_s4] ss:$0 sm:$0xff] }
  0x1e   :  { %430 = vmatpush.bf16.msrb.mxu1 %v686_v43  ;;  %v709_v30 = vld [vmem:[%s946_s5] ss:$0 sm:$0xff]  ;;  %v482_v41 = vand.u32 127, %v481_v40 }
  0x1f   :  { %443 = vmatpush.bf16.msrb.mxu2 %v694_v44  ;;  %456 = vmatpush.bf16.msrb.mxu3 %v702_v46 }
  0x20   :  { %418 = vmatpush.bf16.msrb.mxu0 %v677_v45 }
  0x22   :  { %431 = vmatpush.bf16.msrb.mxu1 %v685_v47 }
  0x23   :  { %444 = vmatpush.bf16.msrb.mxu2 %v693_v50  ;;  %457 = vmatpush.bf16.msrb.mxu3 %v701_v51 }
  0x24   :  { %419 = vmatpush.bf16.msrb.mxu0 %v676_v48 }
  0x26   :  { %432 = vmatpush.bf16.msrb.mxu1 %v684_v49 }
  0x27   :  { %445 = vmatpush.bf16.msrb.mxu2 %v692_v54  ;;  %458 = vmatpush.bf16.msrb.mxu3 %v700_v55 }
  0x28   :  { %420 = vmatpush.bf16.msrb.mxu0 %v675_v52 }
  0x2a   :  { %433 = vmatpush.bf16.msrb.mxu1 %v683_v53 }
  0x2b   :  { %446 = vmatpush.bf16.msrb.mxu2 %v691_v56  ;;  %459 = vmatpush.bf16.msrb.mxu3 %v699_v57 }
  0x88   :  { %v102_v61 = vpop.f32.mrf.mxu0 }
  0x89   :  { %v103_v62 = vadd.f32 %v102_v61, %v41_v59 }
  0x8a   :  { %v115_v63 = vpop.f32.mrf.mxu1 }
  0x8b   :  { %v145_v0 = vmax.f32 %v103_v62, 0.0  ;;  %v116_v1 = vadd.f32 %v115_v63, %v42_v60 }
  0x8d   :  { %v149_v4 = vpack.c.bf16 %v145_v0, %v145_v0  ;;  %v146_v5 = vmax.f32 %v116_v1, 0.0 }
  0x8f   :  { %v150_v6 = vpack.c.bf16 %v146_v5, %v146_v5  ;;  %v128_v7 = vpop.f32.mrf.mxu2  ;;  %421 = vmatmul.bf16.vlgmr.msrb.gmra.mxu0 %v149_v4 }
  0x90   :  { %v141_v8 = vpop.f32.mrf.mxu3  ;;  %v129_v9 = vadd.f32 %v128_v7, %v43_v2  ;;  %v104_v11 = vpop.f32.mrf.mxu0 }
  0x91   :  { %v142_v10 = vadd.f32 %v141_v8, %v44_v3  ;;  %434 = vmatmul.bf16.vlgmr.msrb.gmra.mxu1 %v150_v6 }
  0x92   :  { %v147_v12 = vmax.f32 %v129_v9, 0.0  ;;  %v117_v14 = vpop.f32.mrf.mxu1 }
  0x93   :  { %v148_v13 = vmax.f32 %v142_v10, 0.0 }
  0x94   :  { %v151_v15 = vpack.c.bf16 %v147_v12, %v147_v12 }
  0x95   :  { %v152_v16 = vpack.c.bf16 %v148_v13, %v148_v13 }
  0x96   :  { %447 = vmatmul.bf16.vlgmr.msrb.gmra.mxu2 %v151_v15 }
  0x97   :  { %460 = vmatmul.bf16.vlgmr.msrb.gmra.mxu3 %v152_v16  ;;  %v130_v17 = vpop.f32.mrf.mxu2 }
  0x98   :  { %v143_v18 = vpop.f32.mrf.mxu3 }
 0x10c   :  { %v422_v19 = vpop.f32.mrf.mxu0 }
 0x10d   :  { %v423_v22 = vadd.f32 %v708_v20, %v422_v19 }
 0x10e   :  { %v435_v21 = vpop.f32.mrf.mxu1 }
 0x10f   :  { %v436_v24 = vadd.f32 %v435_v21, %v423_v22 }
 0x114   :  { %v424_v23 = vpop.f32.mrf.mxu0 }
 0x116   :  { %v437_v25 = vpop.f32.mrf.mxu1 }
 0x119   :  { %v448_v26 = vpop.f32.mrf.mxu2 }
 0x11a   :  { %v461_v27 = vpop.f32.mrf.mxu3  ;;  %v449_v28 = vadd.f32 %v448_v26, %v436_v24 }
 0x11c   :  { %v462_v29 = vadd.f32 %v461_v27, %v449_v28 }
 0x11e   :  { %v465_v31 = vmax.f32 %v462_v29, 0.0 }
 0x120   :  { %v470_v32 = vmul.f32 %v709_v30, %v465_v31 }
 0x121   :  { %v450_v33 = vpop.f32.mrf.mxu2 }
 0x122   :  { %v463_v34 = vpop.f32.mrf.mxu3  ;;  %v472_v35 = vsel %vm471_vm1, %v470_v32, 0.0 }
 0x123   :  { %473 = vadd.xlane.f32.xlu0 %v472_v35 }
 0x196   :  { %v474_v37 = vpop.xlane.xlu0 %473 }
 0x197   :  { %v477_v38 = vadd.f32 %v476_v36, %v474_v37 }
 0x199   :  { %v478_v39 = vmul.f32 1.442695, %v477_v38 }
 0x19b   :  { %710 = vpow2.f32 %v478_v39 }
 0x1a1   :  { %v711_v42 = vpop.eup %710 }
 0x1a2   :  { %v483_v43 = vperm.slane %v711_v42, %v482_v41 }
 0x1a4   :  { %486 = vst.msk [vmem:[#allocation3] sm:$0x1] %vm485_vm2, %v483_v43 }
 0x1a5   :  { %497 = dma.vmem_to_hbm [thread:$0]  %s493_s30, 16, %s495_s9, [#allocation4]  }
 0x1a6   :  { %736 = dma.done.wait [#allocation4], 16  }
 0x1a7   :  { %737 = vsyncadd [#allocation4], 4294967280 }
 0x1a8   :  { %502 = vsyncpa [#allocation4], 1 }

</bundles_post_ra>
